<compile_context>
chip_gen: v6e
topology: v6e:2x2x1
jax: 0.10.0
libtpu: 0.0.40
codegen_flags: <defaults>
</compile_context>

<pallas_src>
import functools

import jax
import jax.numpy as jnp
from jax.experimental import pallas as pl
from jax.experimental.pallas import tpu as pltpu


def _round_up(n, m):
    return m * ((n + m - 1) // m)


def _param_layout(i_size, hidden, num_classes):
    """Row/col layout of the packed parameter slab (all row offsets 8-aligned)."""
    off = {}
    r = 0
    off["w1"] = r;   r += _round_up(i_size + hidden, 8)    # [W_ih1^T ; W_hh1^T]
    off["w2i"] = r;  r += _round_up(hidden, 8)             # W_ih2^T
    off["w2h"] = r;  r += _round_up(hidden, 8)             # W_hh2^T
    off["w3i"] = r;  r += _round_up(hidden, 8)             # W_ih3^T
    off["w3h"] = r;  r += _round_up(num_classes, 8)        # W_hh3^T
    off["b1"] = r;   r += 8
    off["b2"] = r;   r += 8
    off["b3"] = r;   r += 8
    off["rows"] = r
    off["cols"] = _round_up(max(4 * hidden, 4 * num_classes, 128), 128)
    return off


def _reorder_gate_cols(a, h):
    """PyTorch gate order [i, f, g, o] -> packed order [i, f, o, g] (last axis)."""
    return jnp.concatenate(
        [a[..., 0:h], a[..., h:2 * h], a[..., 3 * h:4 * h], a[..., 2 * h:3 * h]],
        axis=-1)


def _fused_lstm_kernel(state_ref, params_ref,
                       h1_ref, c1_ref, h2_ref, c2_ref, ho_ref, co_ref,
                       *, i_size, hidden, num_classes, seg, off):
    """Three chained LSTMCells; intermediates never leave VMEM/vregs."""
    H, NC = hidden, num_classes

    def activate(gates, h):
        # Packed gate order [i, f, o, g]: one full-width sigmoid + one tanh
        # on the g block -> 2 EUP pushes instead of 4.
        sig = jax.nn.sigmoid(gates)
        g_t = jnp.tanh(gates[:, 3 * h:4 * h])
        return sig[:, 0:h], sig[:, h:2 * h], sig[:, 2 * h:3 * h], g_t

    # ---- layer 1: single MXU dot on the pre-packed, lane-0-aligned [x|h0]. ----
    xh0 = state_ref[:, 0:i_size + H]
    w1 = params_ref[off["w1"]:off["w1"] + i_size + H, 0:4 * H]
    b1 = params_ref[off["b1"]:off["b1"] + 1, 0:4 * H]
    g1 = jnp.dot(xh0, w1, preferred_element_type=jnp.float32) + b1
    i1, f1, o1, gg1 = activate(g1, H)
    c0 = state_ref[:, 1 * seg:1 * seg + H]
    c_l1 = f1 * c0 + i1 * gg1
    h_l1 = o1 * jnp.tanh(c_l1)

    # ---- layer 2: two accumulated dots (no in-kernel lane concat). ----
    h1_in = state_ref[:, 2 * seg:2 * seg + H]
    c1_in = state_ref[:, 3 * seg:3 * seg + H]
    w2i = params_ref[off["w2i"]:off["w2i"] + H, 0:4 * H]
    w2h = params_ref[off["w2h"]:off["w2h"] + H, 0:4 * H]
    b2 = params_ref[off["b2"]:off["b2"] + 1, 0:4 * H]
    g2 = (jnp.dot(h_l1, w2i, preferred_element_type=jnp.float32)
          + jnp.dot(h1_in, w2h, preferred_element_type=jnp.float32) + b2)
    i2, f2, o2, gg2 = activate(g2, H)
    c_l2 = f2 * c1_in + i2 * gg2
    h_l2 = o2 * jnp.tanh(c_l2)

    # ---- layer 3 (output cell). ----
    h2_in = state_ref[:, 4 * seg:4 * seg + NC]
    c2_in = state_ref[:, 5 * seg:5 * seg + NC]
    w3i = params_ref[off["w3i"]:off["w3i"] + H, 0:4 * NC]
    w3h = params_ref[off["w3h"]:off["w3h"] + NC, 0:4 * NC]
    b3 = params_ref[off["b3"]:off["b3"] + 1, 0:4 * NC]
    g3 = (jnp.dot(h_l2, w3i, preferred_element_type=jnp.float32)
          + jnp.dot(h2_in, w3h, preferred_element_type=jnp.float32) + b3)
    i3, f3, o3, gg3 = activate(g3, NC)
    c_o = f3 * c2_in + i3 * gg3
    h_o = o3 * jnp.tanh(c_o)

    # Six direct stores; no slab concat, no zero padding, f32 state outputs.
    h1_ref[...] = h_l1
    c1_ref[...] = c_l1
    h2_ref[...] = h_l2
    c2_ref[...] = c_l2
    ho_ref[...] = h_o
    co_ref[...] = c_o


def init_lstm_cell_params(key, input_size, hidden_size, dtype=jnp.float32):
    """PyTorch nn.LSTMCell-style init: uniform(-1/sqrt(H), 1/sqrt(H))."""
    k = 1.0 / jnp.sqrt(jnp.asarray(hidden_size, dtype))
    k1, k2, k3, k4 = jax.random.split(key, 4)
    w_ih = jax.random.uniform(k1, (4 * hidden_size, input_size), dtype, -k, k)
    w_hh = jax.random.uniform(k2, (4 * hidden_size, hidden_size), dtype, -k, k)
    b_ih = jax.random.uniform(k3, (4 * hidden_size,), dtype, -k, k)
    b_hh = jax.random.uniform(k4, (4 * hidden_size,), dtype, -k, k)
    return w_ih, w_hh, b_ih, b_hh


class WifiFullLSTMCellsPallas:
    """JAX/Pallas port of Wifi_fullLSTMCells — single fused kernel forward."""

    def __init__(self, i_size, hidden_size, num_classes, key):
        self.input_size = i_size
        self.hidden_size = hidden_size
        self.num_classes = num_classes

        k1, k2, k3 = jax.random.split(key, 3)
        self._raw = (init_lstm_cell_params(k1, i_size, hidden_size),
                     init_lstm_cell_params(k2, hidden_size, hidden_size),
                     init_lstm_cell_params(k3, hidden_size, num_classes))

        self._layout = _param_layout(i_size, hidden_size, num_classes)
        self.params = self._pack_params(self._raw)

        # State-slab segment stride: every state piece starts 128-lane aligned.
        self._seg = 128 * pl.cdiv(
            max(i_size + hidden_size, hidden_size, num_classes), 128)

        self._kernel = functools.partial(
            _fused_lstm_kernel, i_size=i_size, hidden=hidden_size,
            num_classes=num_classes, seg=self._seg, off=self._layout)
        self._forward = jax.jit(self._forward_impl)

    def _pack_params(self, raw):
        H, NC = self.hidden_size, self.num_classes
        L = self._layout
        (w_ih1, w_hh1, b_ih1, b_hh1), (w_ih2, w_hh2, b_ih2, b_hh2), \
            (w_ih3, w_hh3, b_ih3, b_hh3) = raw

        w1 = _reorder_gate_cols(jnp.concatenate([w_ih1.T, w_hh1.T], axis=0), H)
        b1 = _reorder_gate_cols((b_ih1 + b_hh1)[None, :], H)
        w2i = _reorder_gate_cols(w_ih2.T, H)
        w2h = _reorder_gate_cols(w_hh2.T, H)
        b2 = _reorder_gate_cols((b_ih2 + b_hh2)[None, :], H)
        w3i = _reorder_gate_cols(w_ih3.T, NC)
        w3h = _reorder_gate_cols(w_hh3.T, NC)
        b3 = _reorder_gate_cols((b_ih3 + b_hh3)[None, :], NC)

        slab = jnp.zeros((L["rows"], L["cols"]), jnp.float32)

        def put(s, a, row):
            a = a.astype(jnp.float32)
            return s.at[row:row + a.shape[0], 0:a.shape[1]].set(a)

        slab = put(slab, w1, L["w1"])
        slab = put(slab, w2i, L["w2i"])
        slab = put(slab, w2h, L["w2h"])
        slab = put(slab, w3i, L["w3i"])
        slab = put(slab, w3h, L["w3h"])
        slab = put(slab, b1, L["b1"])
        slab = put(slab, b2, L["b2"])
        slab = put(slab, b3, L["b3"])
        return slab

    def _forward_impl(self, x_in, h0, c0, h1, c1, h2, c2):
        B = x_in.shape[0]
        H, NC = self.hidden_size, self.num_classes
        seg = self._seg
        f32 = jnp.float32

        def segment(*pieces):
            parts = [p.astype(f32) for p in pieces]
            w = sum(p.shape[-1] for p in parts)
            if w < seg:
                parts.append(jnp.zeros((B, seg - w), f32))
            return parts[0] if len(parts) == 1 else jnp.concatenate(parts, -1)

        # One lane-aligned state slab -> one input DMA (cheap fused XLA concat).
        state = jnp.concatenate(
            [segment(x_in, h0), segment(c0), segment(h1),
             segment(c1), segment(h2), segment(c2)], axis=-1)

        vmem = pl.BlockSpec(memory_space=pltpu.MemorySpace.VMEM)
        out_shape = (
            jax.ShapeDtypeStruct((B, H), f32),   # hid_lay1
            jax.ShapeDtypeStruct((B, H), f32),   # c_lay1
            jax.ShapeDtypeStruct((B, H), f32),   # hid_lay2
            jax.ShapeDtypeStruct((B, H), f32),   # c_lay2
            jax.ShapeDtypeStruct((B, NC), f32),  # hid_out
            jax.ShapeDtypeStruct((B, NC), f32),  # c_out
        )
        h_l1, c_l1, h_l2, c_l2, h_o, c_o = pl.pallas_call(
            self._kernel,
            out_shape=out_shape,
            in_specs=[vmem, vmem],
            out_specs=(vmem,) * 6,
        )(state, self.params)
        return ((h_o, c_o), (h_l1, c_l1), (h_l2, c_l2))

    def __call__(self, x_in, h0, c0, h1, c1, h2, c2):
        return self._forward(x_in, h0, c0, h1, c1, h2, c2)


def _ref_lstm_cell(x, h, c, params):
    """Pure-JAX nn.LSTMCell reference (PyTorch gate order [i, f, g, o])."""
    w_ih, w_hh, b_ih, b_hh = params
    H = h.shape[-1]
    hp = jax.lax.Precision.HIGHEST
    gates = (jnp.dot(x, w_ih.T, precision=hp)
             + jnp.dot(h, w_hh.T, precision=hp) + b_ih + b_hh)
    i = jax.nn.sigmoid(gates[:, 0:H])
    f = jax.nn.sigmoid(gates[:, H:2 * H])
    g = jnp.tanh(gates[:, 2 * H:3 * H])
    o = jax.nn.sigmoid(gates[:, 3 * H:4 * H])
    c_new = f * c + i * g
    return o * jnp.tanh(c_new), c_new


if __name__ == "__main__":
    B = 2
    I_SIZE = 16
    HIDDEN = 32
    NUM_CLASSES = 8

    key = jax.random.PRNGKey(0)
    k_params, k_x, k_h0, k_c0, k_h1, k_c1, k_h2, k_c2 = jax.random.split(key, 8)

    model = WifiFullLSTMCellsPallas(I_SIZE, HIDDEN, NUM_CLASSES, k_params)

    x_in = jax.random.normal(k_x, (B, I_SIZE), jnp.float32)
    h0 = jax.random.normal(k_h0, (B, HIDDEN), jnp.float32)
    c0 = jax.random.normal(k_c0, (B, HIDDEN), jnp.float32)
    h1 = jax.random.normal(k_h1, (B, HIDDEN), jnp.float32)
    c1 = jax.random.normal(k_c1, (B, HIDDEN), jnp.float32)
    h2 = jax.random.normal(k_h2, (B, NUM_CLASSES), jnp.float32)
    c2 = jax.random.normal(k_c2, (B, NUM_CLASSES), jnp.float32)

    ((hid_out, c_out), (hid_lay1, c_lay1), (hid_lay2, c_lay2)) = model(
        x_in, h0, c0, h1, c1, h2, c2)
    jax.block_until_ready((hid_out, c_out, hid_lay1, c_lay1, hid_lay2, c_lay2))

    # Pure-JAX reference check (matches PyTorch nn.LSTMCell semantics).
    r_h1, r_c1 = _ref_lstm_cell(x_in, h0, c0, model._raw[0])
    r_h2, r_c2 = _ref_lstm_cell(r_h1, h1, c1, model._raw[1])
    r_ho, r_co = _ref_lstm_cell(r_h2, h2, c2, model._raw[2])

    checks = ((hid_lay1, r_h1), (c_lay1, r_c1), (hid_lay2, r_h2),
              (c_lay2, r_c2), (hid_out, r_ho), (c_out, r_co))
    for got, want in checks:
        assert got.shape == want.shape
        assert bool(jnp.all(jnp.isfinite(got)))
        assert bool(jnp.allclose(got, want, rtol=1e-3, atol=1e-3)), (
            float(jnp.max(jnp.abs(got - want))))

    assert hid_out.shape == (B, NUM_CLASSES) and c_out.shape == (B, NUM_CLASSES)
    assert hid_lay1.shape == (B, HIDDEN) and c_lay1.shape == (B, HIDDEN)
    assert hid_lay2.shape == (B, HIDDEN) and c_lay2.shape == (B, HIDDEN)

    print("KERNEL_OK")
</pallas_src>

<mosaic_0001>
module attributes {stable_mosaic.version = 11 : i64} {
  func.func @_fused_lstm_kernel(%arg0: memref<2x768xf32, #tpu.memory_space<vmem>>, %arg1: memref<176x128xf32, #tpu.memory_space<vmem>>, %arg2: memref<2x32xf32, #tpu.memory_space<vmem>>, %arg3: memref<2x32xf32, #tpu.memory_space<vmem>>, %arg4: memref<2x32xf32, #tpu.memory_space<vmem>>, %arg5: memref<2x32xf32, #tpu.memory_space<vmem>>, %arg6: memref<2x8xf32, #tpu.memory_space<vmem>>, %arg7: memref<2x8xf32, #tpu.memory_space<vmem>>) attributes {dimension_semantics = [], scalar_prefetch = 0 : i64, scratch_operands = 0 : i64, tpu.core_type = #tpu.core_type<tc>} {
    %c0 = arith.constant 0 : index
    %c0_0 = arith.constant 0 : index
    %0 = vector.load %arg0[%c0, %c0_0] : memref<2x768xf32, #tpu.memory_space<vmem>>, vector<2x48xf32>
    %c0_1 = arith.constant 0 : index
    %c0_2 = arith.constant 0 : index
    %1 = vector.load %arg1[%c0_1, %c0_2] : memref<176x128xf32, #tpu.memory_space<vmem>>, vector<48x128xf32>
    %c152 = arith.constant 152 : index
    %c0_3 = arith.constant 0 : index
    %2 = vector.load %arg1[%c152, %c0_3] : memref<176x128xf32, #tpu.memory_space<vmem>>, vector<1x128xf32>
    %cst = arith.constant dense<0.000000e+00> : vector<2x128xf32>
    %3 = tpu.matmul %0, %1, %cst {dimension_numbers = #tpu.dot_dimension_numbers<[1], [0], [0], [1], [0, 0, 1, 1], [], []>} : vector<2x48xf32>, vector<48x128xf32>, vector<2x128xf32> -> vector<2x128xf32>
    %4 = vector.broadcast %2 : vector<1x128xf32> to vector<2x128xf32>
    %5 = arith.addf %3, %4 : vector<2x128xf32>
    %6 = arith.negf %5 : vector<2x128xf32>
    %7 = math.exp %6 : vector<2x128xf32>
    %cst_4 = arith.constant 1.000000e+00 : f32
    %8 = vector.broadcast %cst_4 : f32 to vector<2x128xf32>
    %9 = arith.addf %8, %7 : vector<2x128xf32>
    %10 = arith.divf %8, %9 : vector<2x128xf32>
    %11 = vector.extract_strided_slice %5 {offsets = [0, 96], sizes = [2, 32], strides = [1, 1]} : vector<2x128xf32> to vector<2x32xf32>
    %12 = math.tanh %11 : vector<2x32xf32>
    %13 = vector.extract_strided_slice %10 {offsets = [0, 0], sizes = [2, 32], strides = [1, 1]} : vector<2x128xf32> to vector<2x32xf32>
    %14 = vector.extract_strided_slice %10 {offsets = [0, 32], sizes = [2, 32], strides = [1, 1]} : vector<2x128xf32> to vector<2x32xf32>
    %15 = vector.extract_strided_slice %10 {offsets = [0, 64], sizes = [2, 32], strides = [1, 1]} : vector<2x128xf32> to vector<2x32xf32>
    %c0_5 = arith.constant 0 : index
    %c128 = arith.constant 128 : index
    %16 = vector.load %arg0[%c0_5, %c128] : memref<2x768xf32, #tpu.memory_space<vmem>>, vector<2x32xf32>
    %17 = arith.mulf %14, %16 : vector<2x32xf32>
    %18 = arith.mulf %13, %12 : vector<2x32xf32>
    %19 = arith.addf %17, %18 : vector<2x32xf32>
    %20 = math.tanh %19 : vector<2x32xf32>
    %21 = arith.mulf %15, %20 : vector<2x32xf32>
    %c0_6 = arith.constant 0 : index
    %c256 = arith.constant 256 : index
    %22 = vector.load %arg0[%c0_6, %c256] : memref<2x768xf32, #tpu.memory_space<vmem>>, vector<2x32xf32>
    %c0_7 = arith.constant 0 : index
    %c384 = arith.constant 384 : index
    %23 = vector.load %arg0[%c0_7, %c384] : memref<2x768xf32, #tpu.memory_space<vmem>>, vector<2x32xf32>
    %c48 = arith.constant 48 : index
    %c0_8 = arith.constant 0 : index
    %24 = vector.load %arg1[%c48, %c0_8] : memref<176x128xf32, #tpu.memory_space<vmem>>, vector<32x128xf32>
    %c80 = arith.constant 80 : index
    %c0_9 = arith.constant 0 : index
    %25 = vector.load %arg1[%c80, %c0_9] : memref<176x128xf32, #tpu.memory_space<vmem>>, vector<32x128xf32>
    %c160 = arith.constant 160 : index
    %c0_10 = arith.constant 0 : index
    %26 = vector.load %arg1[%c160, %c0_10] : memref<176x128xf32, #tpu.memory_space<vmem>>, vector<1x128xf32>
    %cst_11 = arith.constant dense<0.000000e+00> : vector<2x128xf32>
    %27 = tpu.matmul %21, %24, %cst_11 {dimension_numbers = #tpu.dot_dimension_numbers<[1], [0], [0], [1], [0, 0, 1, 1], [], []>} : vector<2x32xf32>, vector<32x128xf32>, vector<2x128xf32> -> vector<2x128xf32>
    %cst_12 = arith.constant dense<0.000000e+00> : vector<2x128xf32>
    %28 = tpu.matmul %22, %25, %cst_12 {dimension_numbers = #tpu.dot_dimension_numbers<[1], [0], [0], [1], [0, 0, 1, 1], [], []>} : vector<2x32xf32>, vector<32x128xf32>, vector<2x128xf32> -> vector<2x128xf32>
    %29 = arith.addf %27, %28 : vector<2x128xf32>
    %30 = vector.broadcast %26 : vector<1x128xf32> to vector<2x128xf32>
    %31 = arith.addf %29, %30 : vector<2x128xf32>
    %32 = arith.negf %31 : vector<2x128xf32>
    %33 = math.exp %32 : vector<2x128xf32>
    %cst_13 = arith.constant 1.000000e+00 : f32
    %34 = vector.broadcast %cst_13 : f32 to vector<2x128xf32>
    %35 = arith.addf %34, %33 : vector<2x128xf32>
    %36 = arith.divf %34, %35 : vector<2x128xf32>
    %37 = vector.extract_strided_slice %31 {offsets = [0, 96], sizes = [2, 32], strides = [1, 1]} : vector<2x128xf32> to vector<2x32xf32>
    %38 = math.tanh %37 : vector<2x32xf32>
    %39 = vector.extract_strided_slice %36 {offsets = [0, 0], sizes = [2, 32], strides = [1, 1]} : vector<2x128xf32> to vector<2x32xf32>
    %40 = vector.extract_strided_slice %36 {offsets = [0, 32], sizes = [2, 32], strides = [1, 1]} : vector<2x128xf32> to vector<2x32xf32>
    %41 = vector.extract_strided_slice %36 {offsets = [0, 64], sizes = [2, 32], strides = [1, 1]} : vector<2x128xf32> to vector<2x32xf32>
    %42 = arith.mulf %40, %23 : vector<2x32xf32>
    %43 = arith.mulf %39, %38 : vector<2x32xf32>
    %44 = arith.addf %42, %43 : vector<2x32xf32>
    %45 = math.tanh %44 : vector<2x32xf32>
    %46 = arith.mulf %41, %45 : vector<2x32xf32>
    %c0_14 = arith.constant 0 : index
    %c512 = arith.constant 512 : index
    %47 = vector.load %arg0[%c0_14, %c512] : memref<2x768xf32, #tpu.memory_space<vmem>>, vector<2x8xf32>
    %c0_15 = arith.constant 0 : index
    %c640 = arith.constant 640 : index
    %48 = vector.load %arg0[%c0_15, %c640] : memref<2x768xf32, #tpu.memory_space<vmem>>, vector<2x8xf32>
    %c112 = arith.constant 112 : index
    %c0_16 = arith.constant 0 : index
    %49 = vector.load %arg1[%c112, %c0_16] : memref<176x128xf32, #tpu.memory_space<vmem>>, vector<32x32xf32>
    %c144 = arith.constant 144 : index
    %c0_17 = arith.constant 0 : index
    %50 = vector.load %arg1[%c144, %c0_17] : memref<176x128xf32, #tpu.memory_space<vmem>>, vector<8x32xf32>
    %c168 = arith.constant 168 : index
    %c0_18 = arith.constant 0 : index
    %51 = vector.load %arg1[%c168, %c0_18] : memref<176x128xf32, #tpu.memory_space<vmem>>, vector<1x32xf32>
    %cst_19 = arith.constant dense<0.000000e+00> : vector<2x32xf32>
    %52 = tpu.matmul %46, %49, %cst_19 {dimension_numbers = #tpu.dot_dimension_numbers<[1], [0], [0], [1], [0, 0, 1, 1], [], []>} : vector<2x32xf32>, vector<32x32xf32>, vector<2x32xf32> -> vector<2x32xf32>
    %cst_20 = arith.constant dense<0.000000e+00> : vector<2x32xf32>
    %53 = tpu.matmul %47, %50, %cst_20 {dimension_numbers = #tpu.dot_dimension_numbers<[1], [0], [0], [1], [0, 0, 1, 1], [], []>} : vector<2x8xf32>, vector<8x32xf32>, vector<2x32xf32> -> vector<2x32xf32>
    %54 = arith.addf %52, %53 : vector<2x32xf32>
    %55 = vector.broadcast %51 : vector<1x32xf32> to vector<2x32xf32>
    %56 = arith.addf %54, %55 : vector<2x32xf32>
    %57 = arith.negf %56 : vector<2x32xf32>
    %58 = math.exp %57 : vector<2x32xf32>
    %cst_21 = arith.constant 1.000000e+00 : f32
    %59 = vector.broadcast %cst_21 : f32 to vector<2x32xf32>
    %60 = arith.addf %59, %58 : vector<2x32xf32>
    %61 = arith.divf %59, %60 : vector<2x32xf32>
    %62 = vector.extract_strided_slice %56 {offsets = [0, 24], sizes = [2, 8], strides = [1, 1]} : vector<2x32xf32> to vector<2x8xf32>
    %63 = math.tanh %62 : vector<2x8xf32>
    %64 = vector.extract_strided_slice %61 {offsets = [0, 0], sizes = [2, 8], strides = [1, 1]} : vector<2x32xf32> to vector<2x8xf32>
    %65 = vector.extract_strided_slice %61 {offsets = [0, 8], sizes = [2, 8], strides = [1, 1]} : vector<2x32xf32> to vector<2x8xf32>
    %66 = vector.extract_strided_slice %61 {offsets = [0, 16], sizes = [2, 8], strides = [1, 1]} : vector<2x32xf32> to vector<2x8xf32>
    %67 = arith.mulf %65, %48 : vector<2x8xf32>
    %68 = arith.mulf %64, %63 : vector<2x8xf32>
    %69 = arith.addf %67, %68 : vector<2x8xf32>
    %70 = math.tanh %69 : vector<2x8xf32>
    %71 = arith.mulf %66, %70 : vector<2x8xf32>
    %c0_22 = arith.constant 0 : index
    %c0_23 = arith.constant 0 : index
    %72 = vector.load %arg2[%c0_22, %c0_23] : memref<2x32xf32, #tpu.memory_space<vmem>>, vector<2x32xf32>
    tpu.vector_store %arg2[%c0_22, %c0_23], %21 {strides = array<i32>} : memref<2x32xf32, #tpu.memory_space<vmem>>, vector<2x32xf32>,
    %c0_24 = arith.constant 0 : index
    %c0_25 = arith.constant 0 : index
    %73 = vector.load %arg3[%c0_24, %c0_25] : memref<2x32xf32, #tpu.memory_space<vmem>>, vector<2x32xf32>
    tpu.vector_store %arg3[%c0_24, %c0_25], %19 {strides = array<i32>} : memref<2x32xf32, #tpu.memory_space<vmem>>, vector<2x32xf32>,
    %c0_26 = arith.constant 0 : index
    %c0_27 = arith.constant 0 : index
    %74 = vector.load %arg4[%c0_26, %c0_27] : memref<2x32xf32, #tpu.memory_space<vmem>>, vector<2x32xf32>
    tpu.vector_store %arg4[%c0_26, %c0_27], %46 {strides = array<i32>} : memref<2x32xf32, #tpu.memory_space<vmem>>, vector<2x32xf32>,
    %c0_28 = arith.constant 0 : index
    %c0_29 = arith.constant 0 : index
    %75 = vector.load %arg5[%c0_28, %c0_29] : memref<2x32xf32, #tpu.memory_space<vmem>>, vector<2x32xf32>
    tpu.vector_store %arg5[%c0_28, %c0_29], %44 {strides = array<i32>} : memref<2x32xf32, #tpu.memory_space<vmem>>, vector<2x32xf32>,
    %c0_30 = arith.constant 0 : index
    %c0_31 = arith.constant 0 : index
    %76 = vector.load %arg6[%c0_30, %c0_31] : memref<2x8xf32, #tpu.memory_space<vmem>>, vector<2x8xf32>
    tpu.vector_store %arg6[%c0_30, %c0_31], %71 {strides = array<i32>} : memref<2x8xf32, #tpu.memory_space<vmem>>, vector<2x8xf32>,
    %c0_32 = arith.constant 0 : index
    %c0_33 = arith.constant 0 : index
    %77 = vector.load %arg7[%c0_32, %c0_33] : memref<2x8xf32, #tpu.memory_space<vmem>>, vector<2x8xf32>
    tpu.vector_store %arg7[%c0_32, %c0_33], %69 {strides = array<i32>} : memref<2x8xf32, #tpu.memory_space<vmem>>, vector<2x8xf32>,
    return
  }
}

</mosaic_0001>

<bundles_post_ra>
// kernel: _forward_impl.1
= control target key start
LH: loop header
LB: loop body
LE: loop exit
PB: predicated region body
PF: predicated region fallthrough
CT: control target
= control target key end

     0   :  { %13 = vsyncpa [#allocation3], 0  ;;  %s1097_s0 = inlined_call_operand.vmem [shape: f32[2,768], index: 0, kind: input, shape index: {}]   ;;  %s1098_s1 = inlined_call_operand.hbm [shape: f32[176,128], index: 1, kind: input, shape index: {}]   ;;  %s1099_s2 = inlined_call_operand.hbm [shape: f32[2,32], index: 2, kind: output, shape index: {0}]   ;;  %s1100_s3 = inlined_call_operand.hbm [shape: f32[2,32], index: 3, kind: output, shape index: {1}]   ;;  %s1101_s4 = inlined_call_operand.hbm [shape: f32[2,32], index: 4, kind: output, shape index: {2}]   ;;  %s1102_s5 = inlined_call_operand.hbm [shape: f32[2,32], index: 5, kind: output, shape index: {3}]   ;;  %s1103_s6 = inlined_call_operand.hbm [shape: f32[2,8], index: 6, kind: output, shape index: {4}]   ;;  %s1104_s7 = inlined_call_operand.hbm [shape: f32[2,8], index: 7, kind: output, shape index: {5}]  }
   0x1   :  { %14 = vsyncpa [#allocation4], 0 }
   0x2   :  { %15 = vsyncpa [#allocation7], 0 }
   0x3   :  { %16 = vsyncpa [#allocation10], 0 }
   0x4   :  { %17 = vsyncpa [#allocation13], 0  ;;  %s945_s24 = smov [#allocation2]  }
   0x5   :  { %s25_s25 = sshll.u32 %s945_s24, 4  ;;  %s26_s25 = int_to_ptr.vmem [resolvable:$true] %s25_s25 }
   0x6   :  { %s803_s26 = scalar_lea.vmem %s26_s25, 2816  ;;  %p808_p1 = scmp.lt.s32.totalorder %s26_s25, %s26_s25 }
   0x7   :  { %p804_p0 = scmp.ne.s32.totalorder %s26_s25, %s803_s26  ;;  %p809_p2 = scmp.lt.s32.totalorder %s803_s26, %s803_s26 }
   0x9   :  { %p810_p3 = por %p809_p2, %p808_p1 }
   0xb   :  { %p811_p4 = pnand %p810_p3, %p804_p0 }
   0xd   :  { %814 = shalt.err (!%p811_p4)
}
   0xe   :  { %s946_s27 = smov 128   ;;  %s947_s28 = smov 8  }
   0xf   :  { %31 = dma.hbm_to_vmem [thread:$0]  %s1098_s1, 2816, %s26_s25, [#allocation3], %s946_s27, %s946_s27, %s947_s28  }
  0x10   :  { %935 = dma.done.wait [#allocation3], 2816  }
  0x11   :  { %936 = vsyncadd [#allocation3], 4294964480  ;;  %v948_v0 = vmov 0.0   ;;  %vm949_vm0 = vmmov 0   ;;  %v41_v1 = vld [vmem:[#allocation2 + $0x28] sm:$0xff]  ;;  %v40_v2 = vld [vmem:[#allocation2 + $0x20] sm:$0xff] }
  0x12   :  { %701 = vmatprep.subr.mxu0 %v948_v0  ;;  %713 = vmatprep.mubr.msk.f32.mxu0 %vm949_vm0, %v948_v0  ;;  %v39_v3 = vld [vmem:[#allocation2 + $0x18] sm:$0xff]  ;;  %v38_v4 = vld [vmem:[#allocation2 + $0x10] sm:$0xff]  ;;  %v37_v5 = vld [vmem:[#allocation2 + $0x8] sm:$0xff]  ;;  %vm47_vm1 = vcmask 392192   ;;  %s950_s9 = smov 32   ;;  %vm168_vm2 = vcmask 261120  }
  0x13   :  { %716 = vmatprep.subr.mxu1 %v948_v0  ;;  %724 = vmatprep.mubr.msk.f32.mxu1 %vm949_vm0, %v948_v0  ;;  %v36_v6 = vld [vmem:[#allocation2] sm:$0xff]  ;;  %v663_v8 = vld [vmem:[#allocation2 + $0x98] ss:$0 sm:$0xff]  ;;  %v166_v24 = vld [vmem:[#allocation2 + $0x68] sm:$0xff]  ;;  %s951_s14 = smov 64   ;;  %vm555_vm3 = vcmask 254976  }
  0x14   :  { %702 = vmatpush3.msra.mxu0 %v41_v1  ;;  %v35_v7 = vld [vmem:[%s1097_s0] sm:$0x3]  ;;  %v666_v13 = vld.sshfl [vmem:[%s1097_s0 + $0x2] sm:$0x3 pattern:$0x76325410]  ;;  %717 = vmatpush3.msra.mxu1 %v166_v24 }
  0x15   :  { %703 = vmatprep.subr.mxu0 %v948_v0  ;;  %v165_v25 = vld [vmem:[#allocation2 + $0x60] sm:$0xff]  ;;  %718 = vmatprep.subr.mxu1 %v948_v0  ;;  %v164_v26 = vld [vmem:[#allocation2 + $0x58] sm:$0xff]  ;;  %v163_v27 = vld [vmem:[#allocation2 + $0x50] sm:$0xff]  ;;  %vm365_vm4 = vcmask 64512   ;;  %s952_s21 = smov 104   ;;  %s954_s22 = smov 120  }
  0x16   :  { %704 = vmatpush3.msra.mxu0 %v40_v2  ;;  %719 = vmatpush3.msra.mxu1 %v165_v25  ;;  %v157_v28 = vld [vmem:[%s1097_s0 + $0x4] sm:$0x3]  ;;  %v162_v29 = vld [vmem:[#allocation2 + $0x48] sm:$0xff]  ;;  %v160_v32 = vld [vmem:[#allocation2 + $0x38] sm:$0xff]  ;;  %s955_s23 = smov [#allocation6]  }
  0x17   :  { %705 = vmatprep.subr.mxu0 %v948_v0  ;;  %720 = vmatprep.subr.mxu1 %v948_v0  ;;  %v161_v30 = vld [vmem:[#allocation2 + $0x40] sm:$0xff]  ;;  %v159_v33 = vld [vmem:[#allocation2 + $0x30] sm:$0xff]  ;;  %v362_v56 = vld [vmem:[#allocation2 + $0x88] sm:$0xff]  ;;  %s596_s24 = sshll.u32 %s955_s23, 4  ;;  %s597_s24 = int_to_ptr.vmem [resolvable:$true] %s596_s24 }
  0x18   :  { %706 = vmatpush3.msra.mxu0 %v39_v3  ;;  %721 = vmatpush3.msra.mxu1 %v164_v26  ;;  %v671_v36 = vld.sshfl [vmem:[%s1097_s0 + $0x6] sm:$0x3 pattern:$0x76325410]  ;;  %v669_v40 = vld [vmem:[#allocation2 + $0xa0] ss:$0 sm:$0xff]  ;;  %p820_p6 = scmp.lt.s32.totalorder %s597_s24, %s597_s24 }
  0x19   :  { %707 = vmatprep.subr.mxu0 %v948_v0  ;;  %722 = vmatprep.subr.mxu1 %v948_v0  ;;  %v361_v57 = vld [vmem:[#allocation2 + $0x80] sm:$0xff]  ;;  %v363_v58 = vld [vmem:[#allocation2 + $0x90] sm:$0xff]  ;;  %v357_v59 = vld [vmem:[%s1097_s0 + $0x8] sm:$0x3]  ;;  %s815_s25 = scalar_lea.vmem %s597_s24, 32 }
  0x1a   :  { %708 = vmatpush3.msra.mxu0 %v38_v4  ;;  %723 = vmatpush3.msra.mxu1 %v163_v27  ;;  %v360_v60 = vld [vmem:[#allocation2 + $0x78] sm:$0xff]  ;;  %v359_v61 = vld [vmem:[#allocation2 + $0x70] sm:$0xff]  ;;  %v676_v2 = vld.sshfl [vmem:[%s1097_s0 + $0xa] sm:$0x3 pattern:$0x76325410]  ;;  %p816_p5 = scmp.ne.s32.totalorder %s597_s24, %s815_s25  ;;  %p821_p7 = scmp.lt.s32.totalorder %s815_s25, %s815_s25 }
  0x1b   :  { %709 = vmatprep.subr.mxu0 %v948_v0  ;;  %725 = vmatmul.mubr.msk.f32.vlgmr.msra.gmra.mxu1 %vm168_vm2, %v157_v28  ;;  %s953_s0 = smov 96  }
  0x1c   :  { %710 = vmatpush3.msra.mxu0 %v37_v5  ;;  %727 = vmatprep.subr.mxu1 %v948_v0  ;;  %p822_p8 = por %p821_p7, %p820_p6 }
  0x1d   :  { %711 = vmatprep.subr.mxu0 %v948_v0  ;;  %728 = vmatpush3.msra.mxu1 %v162_v29 }
  0x1e   :  { %712 = vmatpush3.msra.mxu0 %v36_v6  ;;  %735 = vmatprep.mubr.msk.f32.mxu1 %vm949_vm0, %v948_v0  ;;  %p823_p9 = pnand %p822_p8, %p816_p5 }
  0x1f   :  { %714 = vmatmul.mubr.msk.f32.vlgmr.msra.gmra.mxu0 %vm47_vm1, %v35_v7  ;;  %743 = vmatprep.subr.mxu0 %v948_v0 }
  0x20   :  { %751 = vmatprep.mubr.msk.f32.mxu0 %vm949_vm0, %v948_v0  ;;  %729 = vmatprep.subr.mxu1 %v948_v0 }
  0x21   :  { %730 = vmatpush3.msra.mxu1 %v161_v30  ;;  %744 = vmatpush3.msra.mxu0 %v362_v56 }
  0x22   :  { %731 = vmatprep.subr.mxu1 %v948_v0  ;;  %745 = vmatprep.subr.mxu0 %v948_v0 }
  0x23   :  { %732 = vmatpush3.msra.mxu1 %v160_v32  ;;  %746 = vmatpush3.msra.mxu0 %v361_v57 }
  0x24   :  { %733 = vmatprep.subr.mxu1 %v948_v0  ;;  %747 = vmatprep.subr.mxu0 %v948_v0 }
  0x25   :  { %734 = vmatpush3.msra.mxu1 %v159_v33  ;;  %748 = vmatpush3.msra.mxu0 %v360_v60 }
  0x26   :  { %738 = vmatprep.subr.mxu1 %v948_v0  ;;  %749 = vmatprep.subr.mxu0 %v948_v0 }
  0x27   :  { %750 = vmatpush3.msra.mxu0 %v359_v61 }
  0xdb   :  { %v238_v37 = vpop.f32.mrf.mxu1 }
  0xdd   :  { %v726_v38 = vpop.f32.mrf.mxu1 }
  0xdf   :  { %v117_v9 = vpop.f32.mrf.mxu0 }
  0xe0   :  { %v118_v10 = vadd.f32 %v663_v8, %v117_v9 }
  0xe1   :  { %v715_v11 = vpop.f32.mrf.mxu0 }
  0xe2   :  { %771 = vtanh.f32 %v118_v10  ;;  %v665_v14 = vmul.f32 -1.442695, %v118_v10 }
  0xe4   :  { %773 = vpow2.f32 %v665_v14 }
  0xef   :  { %v772_v12 = vpop.eup %771 }
  0xf0   :  { %142 = vrot.lane.b32.xlu0 %v772_v12, %s950_s9 }
  0xf1   :  { %v774_v15 = vpop.eup %773 }
  0xf2   :  { %v124_v16 = vadd.f32 1.0, %v774_v15 }
  0xf4   :  { %137 = vrot.lane.b32.xlu0 %v666_v13, %s950_s9  ;;  %775 = vrcp.f32 %v124_v16 }
 0x101   :  { %v776_v17 = vpop.eup %775 }
 0x162   :  { %v143_v18 = vpop.permute.xlu0 %142 }
 0x163   :  { %v145_v19 = vmul.f32 %v776_v17, %v143_v18 }
 0x165   :  { %147 = vrot.lane.b32.xlu1 %v145_v19, %s950_s9 }
 0x166   :  { %v138_v20 = vpop.permute.xlu0 %137 }
 0x167   :  { %v140_v21 = vmul.f32 %v776_v17, %v138_v20 }
 0x1d7   :  { %v148_v22 = vpop.permute.xlu1 %147 }
 0x1d8   :  { %v1029_v23 = vadd.f32 %v148_v22, %v140_v21 }
 0x1da   :  { %777 = vtanh.f32 %v1029_v23 }
 0x1e7   :  { %v778_v31 = vpop.eup %777 }
 0x1e8   :  { %153 = vrot.lane.b32.xlu1 %v778_v31, %s950_s9 }
 0x25a   :  { %v154_v34 = vpop.permute.xlu1 %153 }
 0x25b   :  { %v156_v35 = vmul.f32 %v776_v17, %v154_v34 }
 0x25d   :  { %243 = vrot.lane.b32.xlu0 %v156_v35, %s951_s14 }
 0x261   :  { %337 = vrot.lane.b32.xlu0 %v671_v36, %s950_s9 }
 0x2cf   :  { %v244_v39 = vpop.permute.xlu0 %243 }
 0x2d0   :  { %736 = vmatmul.mubr.msk.f32.vlgmr.msra.gmra.mxu1 %vm168_vm2, %v244_v39  ;;  %556 = vst.msk [vmem:[#allocation5] sm:$0x3] %vm555_vm3, %v244_v39 }
 0x2d1   :  { %740 = vmatprep.mubr.msk.f32.mxu1 %vm949_vm0, %v948_v0  ;;  %739 = vmatpush3.msra.mxu1 %v363_v58  ;;  %v674_v0 = vld [vmem:[#allocation2 + $0xa8] ss:$0 sm:$0xff] }
 0x2d3   :  { %v338_v52 = vpop.permute.xlu0 %337 }
 0x2d4   :  { %741 = vmatmul.mubr.msk.f32.vlgmr.msra.gmra.mxu1 %vm365_vm4, %v357_v59 }
 0x390   :  { %v313_v41 = vpop.f32.mrf.mxu1 }
 0x391   :  { %v314_v42 = vadd.f32 %v313_v41, %v238_v37 }
 0x392   :  { %v737_v43 = vpop.f32.mrf.mxu1 }
 0x393   :  { %v321_v44 = vadd.f32 %v669_v40, %v314_v42 }
 0x394   :  { %v435_v3 = vpop.f32.mrf.mxu1 }
 0x395   :  { %779 = vtanh.f32 %v321_v44  ;;  %v670_v46 = vmul.f32 -1.442695, %v321_v44 }
 0x396   :  { %v742_v4 = vpop.f32.mrf.mxu1 }
 0x397   :  { %781 = vpow2.f32 %v670_v46 }
 0x3a2   :  { %v780_v45 = vpop.eup %779 }
 0x3a3   :  { %342 = vrot.lane.b32.xlu1 %v780_v45, %s950_s9 }
 0x3a4   :  { %v782_v47 = vpop.eup %781 }
 0x3a5   :  { %v325_v48 = vadd.f32 1.0, %v782_v47 }
 0x3a7   :  { %783 = vrcp.f32 %v325_v48 }
 0x3b4   :  { %v784_v49 = vpop.eup %783 }
 0x3b5   :  { %v340_v53 = vmul.f32 %v784_v49, %v338_v52 }
 0x415   :  { %v343_v50 = vpop.permute.xlu1 %342 }
 0x416   :  { %v345_v51 = vmul.f32 %v784_v49, %v343_v50 }
 0x418   :  { %347 = vrot.lane.b32.xlu1 %v345_v51, %s950_s9 }
 0x48a   :  { %v348_v54 = vpop.permute.xlu1 %347 }
 0x48b   :  { %v350_v55 = vadd.f32 %v348_v54, %v340_v53 }
 0x48d   :  { %785 = vtanh.f32 %v350_v55 }
 0x49a   :  { %v786_v62 = vpop.eup %785 }
 0x49b   :  { %353 = vrot.lane.b32.xlu0 %v786_v62, %s950_s9 }
 0x50d   :  { %v354_v63 = vpop.permute.xlu0 %353 }
 0x50e   :  { %v356_v1 = vmul.f32 %v784_v49, %v354_v63 }
 0x510   :  { %440 = vrot.lane.b32.xlu1 %v356_v1, %s951_s14 }
 0x514   :  { %534 = vrot.lane.b32.xlu1 %v676_v2, %s947_s28 }
 0x582   :  { %v441_v5 = vpop.permute.xlu1 %440 }
 0x583   :  { %563 = vst.msk [vmem:[#allocation8] sm:$0x3] %vm555_vm3, %v441_v5  ;;  %752 = vmatmul.mubr.msk.f32.vlgmr.msra.gmra.mxu0 %vm168_vm2, %v441_v5 }
 0x586   :  { %v535_v17 = vpop.permute.xlu1 %534 }
 0x643   :  { %v510_v6 = vpop.f32.mrf.mxu0 }
 0x644   :  { %v511_v7 = vadd.f32 %v510_v6, %v435_v3 }
 0x645   :  { %v753_v8 = vpop.f32.mrf.mxu0 }
 0x646   :  { %v518_v9 = vadd.f32 %v674_v0, %v511_v7 }
 0x648   :  { %787 = vtanh.f32 %v518_v9  ;;  %v675_v11 = vmul.f32 -1.442695, %v518_v9 }
 0x64a   :  { %789 = vpow2.f32 %v675_v11 }
 0x655   :  { %v788_v10 = vpop.eup %787 }
 0x656   :  { %539 = vrot.lane.b32.xlu0 %v788_v10, %s952_s21 }
 0x657   :  { %v790_v12 = vpop.eup %789 }
 0x658   :  { %v522_v13 = vadd.f32 1.0, %v790_v12 }
 0x65a   :  { %791 = vrcp.f32 %v522_v13 }
 0x667   :  { %v792_v14 = vpop.eup %791 }
 0x668   :  { %v537_v18 = vmul.f32 %v792_v14, %v535_v17 }
 0x6c8   :  { %v540_v15 = vpop.permute.xlu0 %539 }
 0x6c9   :  { %v542_v16 = vmul.f32 %v792_v14, %v540_v15 }
 0x6cb   :  { %544 = vrot.lane.b32.xlu0 %v542_v16, %s947_s28 }
 0x6cf   :  { %558 = vrot.lane.b32.xlu0 %v1029_v23, %s953_s0 }
 0x73d   :  { %v545_v19 = vpop.permute.xlu0 %544 }
 0x73e   :  { %v547_v20 = vadd.f32 %v545_v19, %v537_v18 }
 0x740   :  { %793 = vtanh.f32 %v547_v20 }
 0x741   :  { %v559_v21 = vpop.permute.xlu0 %558 }
 0x742   :  { %561 = vst.msk [vmem:[#allocation6] sm:$0x3] %vm555_vm3, %v559_v21 }
 0x74d   :  { %v794_v22 = vpop.eup %793 }
 0x74e   :  { %550 = vrot.lane.b32.xlu1 %v794_v22, %s947_s28 }
 0x752   :  { %565 = vrot.lane.b32.xlu1 %v350_v55, %s953_s0 }
 0x756   :  { %576 = vrot.lane.b32.xlu1 %v547_v20, %s954_s22 }
 0x757   :  { %826 = shalt.err (!%p823_p9)
}
 0x758   :  { %599 = dma.vmem_to_hbm [thread:$0]  %s597_s24, 32, %s1100_s3, [#allocation7]  }
 0x759   :  { %s956_s29 = smov [#allocation5]   ;;  %s957_s28 = smov [#allocation8]  }
 0x75a   :  { %s586_s30 = sshll.u32 %s956_s29, 4  ;;  %s606_s1 = sshll.u32 %s957_s28, 4  ;;  %s587_s30 = int_to_ptr.vmem [resolvable:$true] %s586_s30  ;;  %s607_s1 = int_to_ptr.vmem [resolvable:$true] %s606_s1 }
 0x75b   :  { %s835_s8 = scalar_lea.vmem %s587_s30, 32  ;;  %p840_p11 = scmp.lt.s32.totalorder %s587_s30, %s587_s30 }
 0x75c   :  { %p836_p10 = scmp.ne.s32.totalorder %s587_s30, %s835_s8  ;;  %p841_p12 = scmp.lt.s32.totalorder %s835_s8, %s835_s8 }
 0x75e   :  { %p842_p13 = por %p841_p12, %p840_p11 }
 0x760   :  { %p843_p0 = pnand %p842_p13, %p836_p10 }
 0x762   :  { %846 = shalt.err (!%p843_p0)
}
 0x763   :  { %589 = dma.vmem_to_hbm [thread:$0]  %s587_s30, 32, %s1099_s2, [#allocation4]  }
 0x764   :  { %s855_s11 = scalar_lea.vmem %s607_s1, 32  ;;  %p860_p2 = scmp.lt.s32.totalorder %s607_s1, %s607_s1 }
 0x765   :  { %p856_p1 = scmp.ne.s32.totalorder %s607_s1, %s855_s11  ;;  %p861_p3 = scmp.lt.s32.totalorder %s855_s11, %s855_s11 }
 0x767   :  { %p862_p4 = por %p861_p3, %p860_p2 }
 0x769   :  { %p863_p5 = pnand %p862_p4, %p856_p1 }
 0x76b   :  { %866 = shalt.err (!%p863_p5)
}
 0x76c   :  { %609 = dma.vmem_to_hbm [thread:$0]  %s607_s1, 32, %s1101_s4, [#allocation7]   ;;  %vm573_vm5 = vcmask 58368  }
 0x76d   :  { %s958_s13 = smov [#allocation9]   ;;  %s959_s15 = smov 112  }
 0x76e   :  { %s616_s14 = sshll.u32 %s958_s13, 4  ;;  %s960_s2 = smov [#allocation12]   ;;  %s617_s14 = int_to_ptr.vmem [resolvable:$true] %s616_s14 }
 0x76f   :  { %s636_s16 = sshll.u32 %s960_s2, 4  ;;  %s875_s17 = scalar_lea.vmem %s617_s14, 32  ;;  %s637_s16 = int_to_ptr.vmem [resolvable:$true] %s636_s16 }
 0x770   :  { %p876_p6 = scmp.ne.s32.totalorder %s617_s14, %s875_s17  ;;  %p880_p7 = scmp.lt.s32.totalorder %s617_s14, %s617_s14 }
 0x771   :  { %p881_p8 = scmp.lt.s32.totalorder %s875_s17, %s875_s17 }
 0x773   :  { %p882_p9 = por %p881_p8, %p880_p7 }
 0x775   :  { %p883_p10 = pnand %p882_p9, %p876_p6 }
 0x7c0   :  { %v551_v23 = vpop.permute.xlu1 %550 }
 0x7c1   :  { %v553_v24 = vmul.f32 %v792_v14, %v551_v23 }
 0x7c3   :  { %570 = vrot.lane.b32.xlu0 %v553_v24, %s959_s15 }
 0x7c4   :  { %v566_v25 = vpop.permute.xlu1 %565 }
 0x7c5   :  { %568 = vst.msk [vmem:[#allocation9] sm:$0x3] %vm555_vm3, %v566_v25 }
 0x7c6   :  { %886 = shalt.err (!%p883_p10)
}
 0x7c7   :  { %619 = dma.vmem_to_hbm [thread:$0]  %s617_s14, 32, %s1102_s5, [#allocation10]  }
 0x7c8   :  { %v577_v26 = vpop.permute.xlu1 %576  ;;  %s895_s19 = scalar_lea.vmem %s637_s16, 32  ;;  %p900_p12 = scmp.lt.s32.totalorder %s637_s16, %s637_s16 }
 0x7c9   :  { %579 = vst.msk [vmem:[#allocation12] sm:$0x3] %vm573_vm5, %v577_v26  ;;  %p896_p11 = scmp.ne.s32.totalorder %s637_s16, %s895_s19  ;;  %p901_p13 = scmp.lt.s32.totalorder %s895_s19, %s895_s19 }
 0x7cb   :  { %p902_p0 = por %p901_p13, %p900_p12 }
 0x7cd   :  { %p903_p1 = pnand %p902_p0, %p896_p11 }
 0x7cf   :  { %906 = shalt.err (!%p903_p1)
}
 0x7d0   :  { %639 = dma.vmem_to_hbm [thread:$0]  %s637_s16, 32, %s1104_s7, [#allocation13]  }
 0x7d1   :  { %s961_s0 = smov [#allocation11]  }
 0x7d2   :  { %s626_s22 = sshll.u32 %s961_s0, 4  ;;  %s627_s22 = int_to_ptr.vmem [resolvable:$true] %s626_s22 }
 0x7d3   :  { %s915_s5 = scalar_lea.vmem %s627_s22, 32  ;;  %p920_p3 = scmp.lt.s32.totalorder %s627_s22, %s627_s22 }
 0x7d4   :  { %p916_p2 = scmp.ne.s32.totalorder %s627_s22, %s915_s5  ;;  %p921_p4 = scmp.lt.s32.totalorder %s915_s5, %s915_s5 }
 0x7d6   :  { %p922_p5 = por %p921_p4, %p920_p3 }
 0x7d8   :  { %p923_p6 = pnand %p922_p5, %p916_p2 }
 0x835   :  { %v571_v27 = vpop.permute.xlu0 %570 }
 0x836   :  { %574 = vst.msk [vmem:[#allocation11] sm:$0x3] %vm573_vm5, %v571_v27 }
 0x837   :  { %926 = shalt.err (!%p923_p6)
}
 0x838   :  { %629 = dma.vmem_to_hbm [thread:$0]  %s627_s22, 32, %s1103_s6, [#allocation10]  }
 0x839   :  { %937 = dma.done.wait [#allocation4], 32  }
 0x83a   :  { %938 = vsyncadd [#allocation4], 4294967264 }
 0x83b   :  { %939 = dma.done.wait [#allocation7], 64  }
 0x83c   :  { %940 = vsyncadd [#allocation7], 4294967232 }
 0x83d   :  { %941 = dma.done.wait [#allocation10], 64  }
 0x83e   :  { %942 = vsyncadd [#allocation10], 4294967232 }
 0x83f   :  { %943 = dma.done.wait [#allocation13], 32  }
 0x840   :  { %944 = vsyncadd [#allocation13], 4294967264 }
 0x841   :  { %658 = vsyncpa [#allocation3], 1 }
 0x842   :  { %659 = vsyncpa [#allocation4], 1 }
 0x843   :  { %660 = vsyncpa [#allocation7], 1 }
 0x844   :  { %661 = vsyncpa [#allocation10], 1 }
 0x845   :  { %662 = vsyncpa [#allocation13], 1 }

</bundles_post_ra>
